<compile_context>
chip_gen: v7x
topology: tpu7x:2x2x1
jax: 0.10.0
libtpu: 0.0.40
codegen_flags: <defaults>
</compile_context>

<pallas_src>
import numpy as np
import jax
import jax.numpy as jnp
from jax.experimental import pallas as pl
from jax.experimental.pallas import tpu as pltpu


def _round_up(x, m):
    return ((x + m - 1) // m) * m


def _vmem_limit(block_bytes):
    """Generation-aware VMEM request: 2x blocks + headroom, capped below the
    physical per-core VMEM (64 MiB on v7x, 128 MiB on v5e/v6e)."""
    try:
        cap = int(pltpu.get_tpu_info().vmem_capacity_bytes)
    except Exception:
        cap = 64 * 1024 * 1024          # conservative fallback (v7x per-core)
    ceiling = (cap * 3) // 4            # leave compiler-scratch headroom
    want = 2 * int(block_bytes) + 8 * 1024 * 1024
    return int(max(16 * 1024 * 1024, min(ceiling, want)))


def _const_spec(shape, index_map, single_buffer):
    """BlockSpec for a grid-constant operand: one VMEM buffer is enough (there
    is no re-DMA to hide), reclaiming VMEM for larger HW tiles."""
    if single_buffer:
        try:
            return pl.BlockSpec(shape, index_map, pipeline_mode=pl.Buffered(1))
        except Exception:               # older jax without pipeline_mode
            pass
    return pl.BlockSpec(shape, index_map)


# ----------------------------------------------------------------------------
# Exact constant linear operators (built once at init time, NumPy).
# ----------------------------------------------------------------------------
def adaptive_pool_matrix(H, W, s):
    """P of shape (s*s, H*W): pooled_flat = P @ feats_flat (AdaptiveAvgPool2d)."""
    P = np.zeros((s * s, H * W), dtype=np.float32)
    for i in range(s):
        hs, he = (i * H) // s, -(-((i + 1) * H) // s)
        for j in range(s):
            ws, we = (j * W) // s, -(-((j + 1) * W) // s)
            area = (he - hs) * (we - ws)
            for y in range(hs, he):
                for x in range(ws, we):
                    P[i * s + j, y * W + x] = 1.0 / area
    return P


def _bilinear_1d(out_size, in_size, align_corners=False):
    U = np.zeros((out_size, in_size), dtype=np.float32)
    if in_size == 1:
        U[:, 0] = 1.0
        return U
    for d in range(out_size):
        if align_corners:
            src = d * (in_size - 1) / max(out_size - 1, 1)
        else:
            src = max((d + 0.5) * in_size / out_size - 0.5, 0.0)
        i0 = min(int(np.floor(src)), in_size - 1)
        lam = src - i0
        i1 = min(i0 + 1, in_size - 1)
        U[d, i0] += 1.0 - lam
        U[d, i1] += lam
    return U


def bilinear_upsample_matrix(H, W, s, align_corners=False):
    """U of shape (H*W, s*s): upsampled_flat = U @ pooled_flat."""
    return np.kron(_bilinear_1d(H, s, align_corners),
                   _bilinear_1d(W, s, align_corners))


# ----------------------------------------------------------------------------
# Kernel 1: adaptive-avg-pool accumulated over HW tiles (NCHW-native).
# ----------------------------------------------------------------------------
def _pool_kernel(x_ref, pt_ref, pooled_ref):
    """grid = (N, HW_p // tm1); axis 1 is the HW reduction ("arbitrary").

    x_ref      : (C, tm1)   feature tile for batch n (channels-as-sublanes)
    pt_ref     : (tm1, S2p) pooling operator rows for this HW tile
    pooled_ref : (C, S2p)   f32 output block, resident across the reduction
    """
    @pl.when(pl.program_id(1) == 0)
    def _init():
        pooled_ref[...] = jnp.zeros_like(pooled_ref)

    pooled_ref[...] += jnp.dot(x_ref[...], pt_ref[...],
                               preferred_element_type=jnp.float32)


# ----------------------------------------------------------------------------
# Kernel 2: fused identity path + upsampled stage sum + bias + ReLU.
# ----------------------------------------------------------------------------
def _bottleneck_kernel(x_ref, ut_ref, z_ref, w_ref, b_ref, o_ref):
    """o = ReLU(M_last @ X_tile + Z_n @ U^T_tile + b); lane dim = HW tile.

    x_ref : (C, tm2)      ut_ref : (S2p, tm2)   z_ref : (OUTp, S2p)
    w_ref : (OUTp, C)     b_ref  : (OUTp, 1)    o_ref : (OUTp, tm2)
    """
    acc = jnp.dot(w_ref[...], x_ref[...], preferred_element_type=jnp.float32)
    acc = acc + jnp.dot(z_ref[...], ut_ref[...],
                        preferred_element_type=jnp.float32)
    acc = acc + b_ref[...]                      # (OUTp, 1) broadcast over lanes
    o_ref[...] = jnp.maximum(acc, 0.0).astype(o_ref.dtype)


# ----------------------------------------------------------------------------
# Init-time fold of module parameters into kernel-ready operators.
# ----------------------------------------------------------------------------
def fold_psp_params(params, sizes, H, W, tile_m_pool=512, tile_m_out=256,
                    align_corners=False):
    C = params["stage_w"][sizes[0]].shape[0]
    OUT = params["bottleneck_w"].shape[1]
    HW = H * W
    S2 = int(sum(s * s for s in sizes))

    # HW tiling: kernel-2 tile tm2, kernel-1 tile tm1 (a multiple of tm2 so a
    # single zero-padded HW_p serves both grids).
    if HW <= tile_m_out:
        tm2 = _round_up(HW, 8)
        tm1 = tm2
    else:
        assert tile_m_out % 128 == 0 and tile_m_pool % 128 == 0
        tm2 = tile_m_out
        tm1 = max(tile_m_pool, tm2)
        tm1 = (tm1 // tm2) * tm2
    HW_p = _round_up(HW, tm1)

    S2p = _round_up(S2, 64)     # dense sublane/lane layout for the pyramid axis
    OUTp = _round_up(OUT, 8)    # OUT is a sublane dim in the NCHW-native layout

    # Spatial operators (transposed for NCHW-native layout), zero-padded.
    P_all = np.concatenate([adaptive_pool_matrix(H, W, s) for s in sizes], 0)
    U_cat = np.concatenate(
        [bilinear_upsample_matrix(H, W, s, align_corners) for s in sizes], 1)
    P_allT = np.zeros((HW_p, S2p), np.float32)
    P_allT[:HW, :S2] = P_all.T
    U_catT = np.zeros((S2p, HW_p), np.float32)
    U_catT[:S2, :HW] = U_cat.T

    # Channel operators folded with the bottleneck (left-multiplication form).
    Bw = params["bottleneck_w"]                                  # (5C, OUT)
    M_stack = np.zeros((len(sizes), OUTp, C), np.float32)
    for si, s in enumerate(sizes):
        m_right = np.asarray(params["stage_w"][s] @ Bw[si * C:(si + 1) * C, :])
        M_stack[si, :OUT, :] = m_right.T                         # (OUT, C)
    M_last = np.zeros((OUTp, C), np.float32)
    M_last[:OUT, :] = np.asarray(Bw[len(sizes) * C:, :]).T
    bias = np.zeros((OUTp, 1), np.float32)
    bias[:OUT, 0] = np.asarray(params["bottleneck_b"])

    return dict(
        P_allT=jnp.asarray(P_allT),    # (HW_p, S2p)
        U_catT=jnp.asarray(U_catT),    # (S2p, HW_p)
        M_stack=jnp.asarray(M_stack),  # (num_stages, OUTp, C)
        M_last=jnp.asarray(M_last),    # (OUTp, C)
        bias=jnp.asarray(bias),        # (OUTp, 1)
        sizes=tuple(sizes), C=C, OUT=OUT, OUTp=OUTp,
        HW=HW, HW_p=HW_p, tm1=tm1, tm2=tm2, S2=S2, S2p=S2p,
    )


# ----------------------------------------------------------------------------
# PSPModule forward (Pallas-backed, two kernels + one tiny XLA einsum).
# ----------------------------------------------------------------------------
def psp_forward(feats_nchw, ops, compute_dtype=jnp.float32,
                single_buffer_consts=True):
    N, C, H, W = feats_nchw.shape
    sizes = ops["sizes"]
    HW, HW_p = ops["HW"], ops["HW_p"]
    tm1, tm2 = ops["tm1"], ops["tm2"]
    S2, S2p, OUT, OUTp = ops["S2"], ops["S2p"], ops["OUT"], ops["OUTp"]
    num_m1, num_m2 = HW_p // tm1, HW_p // tm2
    isz = np.dtype(compute_dtype).itemsize

    # NCHW -> (N, C, HW) is a metadata-only reshape (no transpose pass).
    x = feats_nchw.reshape(N, C, HW)
    if HW_p != HW:
        x = jnp.pad(x, ((0, 0), (0, 0), (0, HW_p - HW)))
    x = x.astype(compute_dtype)

    p_t = ops["P_allT"].astype(compute_dtype)
    u_t = ops["U_catT"].astype(compute_dtype)
    m_last = ops["M_last"].astype(compute_dtype)
    bias = ops["bias"]                                           # f32

    # ---- Kernel 1: pooled[n, :, :] = X_n @ P^T  (accumulated over HW tiles) --
    blk1 = (C * tm1 + tm1 * S2p) * isz + C * S2p * 4
    pooled = pl.pallas_call(
        _pool_kernel,
        out_shape=jax.ShapeDtypeStruct((N, C, S2p), jnp.float32),
        grid_spec=pltpu.PrefetchScalarGridSpec(
            num_scalar_prefetch=0,
            grid=(N, num_m1),
            in_specs=[
                pl.BlockSpec((None, C, tm1), lambda n, k: (n, 0, k)),   # X
                pl.BlockSpec((tm1, S2p), lambda n, k: (k, 0)),          # P^T
            ],
            out_specs=pl.BlockSpec((None, C, S2p), lambda n, k: (n, 0, 0)),
        ),
        compiler_params=pltpu.CompilerParams(
            dimension_semantics=("parallel", "arbitrary"),
            vmem_limit_bytes=_vmem_limit(blk1),
        ),
        cost_estimate=pl.CostEstimate(
            flops=2 * N * C * HW_p * S2p,
            transcendentals=0,
            bytes_accessed=(N * C * HW_p * isz + HW_p * S2p * isz
                            + N * C * S2p * 4),
        ),
    )(x, p_t)

    # ---- Tiny XLA step: folded per-stage 1x1 convs  Z_s = M_s @ pooled_s -----
    z_parts, off = [], 0
    for si, s in enumerate(sizes):
        rows = s * s
        z_parts.append(jnp.einsum("oc,ncp->nop", ops["M_stack"][si],
                                  pooled[:, :, off:off + rows]))
        off += rows
    z = jnp.concatenate(z_parts, axis=-1)                        # (N, OUTp, S2)
    if S2p != S2:
        z = jnp.pad(z, ((0, 0), (0, 0), (0, S2p - S2)))
    z = z.astype(compute_dtype)

    # ---- Kernel 2: ReLU(M_last @ X + Z @ U^T + b), lane-dense HW tiles -------
    blk2 = ((C * tm2 + S2p * tm2 + OUTp * S2p + OUTp * C) * isz
            + OUTp * 4 + OUTp * tm2 * isz)
    out = pl.pallas_call(
        _bottleneck_kernel,
        out_shape=jax.ShapeDtypeStruct((N, OUTp, HW_p), compute_dtype),
        grid_spec=pltpu.PrefetchScalarGridSpec(
            num_scalar_prefetch=0,
            grid=(N, num_m2),
            in_specs=[
                pl.BlockSpec((None, C, tm2), lambda n, m: (n, 0, m)),     # X
                pl.BlockSpec((S2p, tm2), lambda n, m: (0, m)),            # U^T
                pl.BlockSpec((None, OUTp, S2p), lambda n, m: (n, 0, 0)),  # Z
                _const_spec((OUTp, C), lambda n, m: (0, 0),
                            single_buffer_consts),                       # M_last
                _const_spec((OUTp, 1), lambda n, m: (0, 0),
                            single_buffer_consts),                       # bias
            ],
            out_specs=pl.BlockSpec((None, OUTp, tm2), lambda n, m: (n, 0, m)),
        ),
        compiler_params=pltpu.CompilerParams(
            dimension_semantics=("parallel", "parallel"),
            vmem_limit_bytes=_vmem_limit(blk2),
        ),
        cost_estimate=pl.CostEstimate(
            flops=2 * N * HW_p * OUTp * (C + S2p),
            transcendentals=0,
            bytes_accessed=(N * C * HW_p * isz + S2p * HW_p * isz
                            + N * OUTp * S2p * isz + OUTp * C * isz
                            + OUTp * 4 + N * OUTp * HW_p * isz),
        ),
    )(x, u_t, z, m_last, bias)

    # Slice off padding; (N, OUT, HW) -> (N, OUT, H, W) is a free reshape.
    return out[:, :OUT, :HW].reshape(N, OUT, H, W)


# ----------------------------------------------------------------------------
# Pure-JAX, un-folded reference mirroring the PyTorch forward (verification).
# ----------------------------------------------------------------------------
def psp_forward_ref(feats_nchw, params, sizes=(1, 2, 3, 6), align_corners=False):
    N, C, H, W = feats_nchw.shape
    x = jnp.transpose(feats_nchw, (0, 2, 3, 1)).reshape(N, H * W, C)
    priors = []
    for s in sizes:
        P = jnp.asarray(adaptive_pool_matrix(H, W, s))
        U = jnp.asarray(bilinear_upsample_matrix(H, W, s, align_corners))
        pooled = jnp.einsum("pq,nqc->npc", P, x)
        conv = jnp.einsum("npc,cd->npd", pooled, params["stage_w"][s])
        priors.append(jnp.einsum("pq,nqc->npc", U, conv))
    cat = jnp.concatenate(priors + [x], axis=-1)
    out = jnp.einsum("npk,kd->npd", cat, params["bottleneck_w"])
    out = jnp.maximum(out + params["bottleneck_b"], 0.0)
    OUT = params["bottleneck_w"].shape[1]
    return out.reshape(N, H, W, OUT).transpose(0, 3, 1, 2)


# ----------------------------------------------------------------------------
# Deterministic parameter init (matches the PyTorch layer shapes).
# ----------------------------------------------------------------------------
def init_params(key, features, out_features, sizes):
    keys = jax.random.split(key, len(sizes) + 2)
    params = {"stage_w": {}}
    for k, s in enumerate(sizes):
        # Conv2d(features, features, 1, bias=False) weight in matmul form.
        params["stage_w"][s] = 0.1 * jax.random.normal(
            keys[k], (features, features), jnp.float32)
    kin = features * (len(sizes) + 1)
    params["bottleneck_w"] = 0.1 * jax.random.normal(
        keys[-2], (kin, out_features), jnp.float32)
    params["bottleneck_b"] = 0.01 * jax.random.normal(
        keys[-1], (out_features,), jnp.float32)
    return params


if __name__ == "__main__":
    # Small shapes consistent with the module: batch=2, features=4, 16x16 map,
    # out_features=32, pyramid sizes (1, 2, 3, 6).
    N, C, H, W = 2, 4, 16, 16
    OUT = 32
    SIZES = (1, 2, 3, 6)

    key = jax.random.PRNGKey(0)
    k_x, k_p = jax.random.split(key)
    feats = jax.random.normal(k_x, (N, C, H, W), jnp.float32)   # NCHW (PyTorch)
    params = init_params(k_p, C, OUT, SIZES)

    # Init-time fold of the constant operators (cached in a real model).
    ops = fold_psp_params(params, SIZES, H, W)

    # f32 operand path (tight check against the un-fused pure-JAX reference).
    try:
        out = jax.block_until_ready(psp_forward(feats, ops, jnp.float32, True))
        single_buf = True
    except Exception:
        # Fallback for jax builds that reject single-buffered constant specs.
        out = jax.block_until_ready(psp_forward(feats, ops, jnp.float32, False))
        single_buf = False
    assert out.shape == (N, OUT, H, W), out.shape

    ref = jax.block_until_ready(psp_forward_ref(feats, params, SIZES))
    np.testing.assert_allclose(np.asarray(out), np.asarray(ref),
                               rtol=2e-4, atol=2e-5)

    # bf16 operand path (production config: half the HBM bytes, ~2x MXU rate).
    out_bf16 = jax.block_until_ready(
        psp_forward(feats, ops, jnp.bfloat16, single_buf))
    np.testing.assert_allclose(np.asarray(out_bf16).astype(np.float32),
                               np.asarray(ref), rtol=5e-2, atol=5e-2)

    print("KERNEL_OK")
</pallas_src>

<mosaic_0001>
module attributes {stable_mosaic.version = 11 : i64} {
  func.func @_pool_kernel(%arg0: i32, %arg1: i32, %arg2: memref<1x4x256xf32, #tpu.memory_space<vmem>>, %arg3: memref<256x64xf32, #tpu.memory_space<vmem>>, %arg4: memref<1x4x64xf32, #tpu.memory_space<vmem>>) attributes {dimension_semantics = [#tpu.dimension_semantics<parallel>, #tpu.dimension_semantics<arbitrary>], iteration_bounds = array<i64: 2, 1>, scalar_prefetch = 0 : i64, scratch_operands = 0 : i64, tpu.core_type = #tpu.core_type<tc>, window_params = [{transform_indices = @transform_0, window_bounds = array<i64: 1, 4, 256>}, {transform_indices = @transform_1, window_bounds = array<i64: 256, 64>}, {transform_indices = @transform_2, window_bounds = array<i64: 1, 4, 64>}]} {
    %c0_i32 = arith.constant 0 : i32
    %0 = arith.cmpi eq, %arg1, %c0_i32 : i32
    %1 = arith.extui %0 : i1 to i32
    %c0_i32_0 = arith.constant 0 : i32
    %2 = arith.cmpi ne, %1, %c0_i32_0 : i32
    scf.if %2 {
      %cst_11 = arith.constant 0.000000e+00 : f32
      %13 = vector.broadcast %cst_11 : f32 to vector<4x64xf32>
      %c0_12 = arith.constant 0 : index
      %c0_13 = arith.constant 0 : index
      %c0_14 = arith.constant 0 : index
      %14 = vector.load %arg4[%c0_12, %c0_13, %c0_14] : memref<1x4x64xf32, #tpu.memory_space<vmem>>, vector<1x4x64xf32>
      %15 = vector.shape_cast %14 : vector<1x4x64xf32> to vector<4x64xf32>
      %16 = vector.shape_cast %13 : vector<4x64xf32> to vector<1x4x64xf32>
      tpu.vector_store %arg4[%c0_12, %c0_13, %c0_14], %16 {strides = array<i32>} : memref<1x4x64xf32, #tpu.memory_space<vmem>>, vector<1x4x64xf32>,
    } else {
    }
    %c0 = arith.constant 0 : index
    %c0_1 = arith.constant 0 : index
    %c0_2 = arith.constant 0 : index
    %3 = vector.load %arg4[%c0, %c0_1, %c0_2] : memref<1x4x64xf32, #tpu.memory_space<vmem>>, vector<1x4x64xf32>
    %4 = vector.shape_cast %3 : vector<1x4x64xf32> to vector<4x64xf32>
    %c0_3 = arith.constant 0 : index
    %c0_4 = arith.constant 0 : index
    %c0_5 = arith.constant 0 : index
    %5 = vector.load %arg2[%c0_3, %c0_4, %c0_5] : memref<1x4x256xf32, #tpu.memory_space<vmem>>, vector<1x4x256xf32>
    %6 = vector.shape_cast %5 : vector<1x4x256xf32> to vector<4x256xf32>
    %c0_6 = arith.constant 0 : index
    %c0_7 = arith.constant 0 : index
    %7 = vector.load %arg3[%c0_6, %c0_7] : memref<256x64xf32, #tpu.memory_space<vmem>>, vector<256x64xf32>
    %cst = arith.constant dense<0.000000e+00> : vector<4x64xf32>
    %8 = tpu.matmul %6, %7, %cst {dimension_numbers = #tpu.dot_dimension_numbers<[1], [0], [0], [1], [0, 0, 1, 1], [], []>} : vector<4x256xf32>, vector<256x64xf32>, vector<4x64xf32> -> vector<4x64xf32>
    %9 = arith.addf %4, %8 : vector<4x64xf32>
    %c0_8 = arith.constant 0 : index
    %c0_9 = arith.constant 0 : index
    %c0_10 = arith.constant 0 : index
    %10 = vector.load %arg4[%c0_8, %c0_9, %c0_10] : memref<1x4x64xf32, #tpu.memory_space<vmem>>, vector<1x4x64xf32>
    %11 = vector.shape_cast %10 : vector<1x4x64xf32> to vector<4x64xf32>
    %12 = vector.shape_cast %9 : vector<4x64xf32> to vector<1x4x64xf32>
    tpu.vector_store %arg4[%c0_8, %c0_9, %c0_10], %12 {strides = array<i32>} : memref<1x4x64xf32, #tpu.memory_space<vmem>>, vector<1x4x64xf32>,
    return
  }
  func.func @transform_0(%arg0: i32, %arg1: i32) -> (i32, i32, i32) {
    %c0_i32 = arith.constant 0 : i32
    %c0_i32_0 = arith.constant 0 : i32
    return %arg0, %c0_i32, %arg1 : i32, i32, i32
  }
  func.func @transform_1(%arg0: i32, %arg1: i32) -> (i32, i32) {
    %c0_i32 = arith.constant 0 : i32
    %c0_i32_0 = arith.constant 0 : i32
    return %arg1, %c0_i32 : i32, i32
  }
  func.func @transform_2(%arg0: i32, %arg1: i32) -> (i32, i32, i32) {
    %c0_i32 = arith.constant 0 : i32
    %c0_i32_0 = arith.constant 0 : i32
    %c0_i32_1 = arith.constant 0 : i32
    return %arg0, %c0_i32, %c0_i32_0 : i32, i32, i32
  }
}

module attributes {stable_mosaic.version = 11 : i64} {
  func.func @_pool_kernel(%arg0: i32, %arg1: i32, %arg2: memref<1x4x256xf32, #tpu.memory_space<vmem>>, %arg3: memref<256x64xf32, #tpu.memory_space<vmem>>, %arg4: memref<1x4x64xf32, #tpu.memory_space<vmem>>) attributes {dimension_semantics = [#tpu.dimension_semantics<parallel>, #tpu.dimension_semantics<arbitrary>], iteration_bounds = array<i64: 2, 1>, scalar_prefetch = 0 : i64, scratch_operands = 0 : i64, tpu.core_type = #tpu.core_type<tc>, window_params = [{transform_indices = @transform_0, window_bounds = array<i64: 1, 4, 256>}, {transform_indices = @transform_1, window_bounds = array<i64: 256, 64>}, {transform_indices = @transform_2, window_bounds = array<i64: 1, 4, 64>}]} {
    %c0_i32 = arith.constant 0 : i32
    %0 = arith.cmpi eq, %arg1, %c0_i32 : i32
    %1 = arith.extui %0 : i1 to i32
    %c0_i32_0 = arith.constant 0 : i32
    %2 = arith.cmpi ne, %1, %c0_i32_0 : i32
    scf.if %2 {
      %cst_11 = arith.constant 0.000000e+00 : f32
      %13 = vector.broadcast %cst_11 : f32 to vector<4x64xf32>
      %c0_12 = arith.constant 0 : index
      %c0_13 = arith.constant 0 : index
      %c0_14 = arith.constant 0 : index
      %14 = vector.load %arg4[%c0_12, %c0_13, %c0_14] : memref<1x4x64xf32, #tpu.memory_space<vmem>>, vector<1x4x64xf32>
      %15 = vector.shape_cast %14 : vector<1x4x64xf32> to vector<4x64xf32>
      %16 = vector.shape_cast %13 : vector<4x64xf32> to vector<1x4x64xf32>
      tpu.vector_store %arg4[%c0_12, %c0_13, %c0_14], %16 {strides = array<i32>} : memref<1x4x64xf32, #tpu.memory_space<vmem>>, vector<1x4x64xf32>,
    } else {
    }
    %c0 = arith.constant 0 : index
    %c0_1 = arith.constant 0 : index
    %c0_2 = arith.constant 0 : index
    %3 = vector.load %arg4[%c0, %c0_1, %c0_2] : memref<1x4x64xf32, #tpu.memory_space<vmem>>, vector<1x4x64xf32>
    %4 = vector.shape_cast %3 : vector<1x4x64xf32> to vector<4x64xf32>
    %c0_3 = arith.constant 0 : index
    %c0_4 = arith.constant 0 : index
    %c0_5 = arith.constant 0 : index
    %5 = vector.load %arg2[%c0_3, %c0_4, %c0_5] : memref<1x4x256xf32, #tpu.memory_space<vmem>>, vector<1x4x256xf32>
    %6 = vector.shape_cast %5 : vector<1x4x256xf32> to vector<4x256xf32>
    %c0_6 = arith.constant 0 : index
    %c0_7 = arith.constant 0 : index
    %7 = vector.load %arg3[%c0_6, %c0_7] : memref<256x64xf32, #tpu.memory_space<vmem>>, vector<256x64xf32>
    %cst = arith.constant dense<0.000000e+00> : vector<4x64xf32>
    %8 = tpu.matmul %6, %7, %cst {dimension_numbers = #tpu.dot_dimension_numbers<[1], [0], [0], [1], [0, 0, 1, 1], [], []>} : vector<4x256xf32>, vector<256x64xf32>, vector<4x64xf32> -> vector<4x64xf32>
    %9 = arith.addf %4, %8 : vector<4x64xf32>
    %c0_8 = arith.constant 0 : index
    %c0_9 = arith.constant 0 : index
    %c0_10 = arith.constant 0 : index
    %10 = vector.load %arg4[%c0_8, %c0_9, %c0_10] : memref<1x4x64xf32, #tpu.memory_space<vmem>>, vector<1x4x64xf32>
    %11 = vector.shape_cast %10 : vector<1x4x64xf32> to vector<4x64xf32>
    %12 = vector.shape_cast %9 : vector<4x64xf32> to vector<1x4x64xf32>
    tpu.vector_store %arg4[%c0_8, %c0_9, %c0_10], %12 {strides = array<i32>} : memref<1x4x64xf32, #tpu.memory_space<vmem>>, vector<1x4x64xf32>,
    return
  }
  func.func @transform_0(%arg0: i32, %arg1: i32) -> (i32, i32, i32) {
    %c0_i32 = arith.constant 0 : i32
    %c0_i32_0 = arith.constant 0 : i32
    return %arg0, %c0_i32, %arg1 : i32, i32, i32
  }
  func.func @transform_1(%arg0: i32, %arg1: i32) -> (i32, i32) {
    %c0_i32 = arith.constant 0 : i32
    %c0_i32_0 = arith.constant 0 : i32
    return %arg1, %c0_i32 : i32, i32
  }
  func.func @transform_2(%arg0: i32, %arg1: i32) -> (i32, i32, i32) {
    %c0_i32 = arith.constant 0 : i32
    %c0_i32_0 = arith.constant 0 : i32
    %c0_i32_1 = arith.constant 0 : i32
    return %arg0, %c0_i32, %c0_i32_0 : i32, i32, i32
  }
}

</mosaic_0001>

<bundles_post_ra>
// kernel: tpu_custom_call.1
= control target key start
LH: loop header
LB: loop body
LE: loop exit
PB: predicated region body
PF: predicated region fallthrough
CT: control target
= control target key end

     0   :  { %7 = vsyncpa [#allocation3], 0  ;;  %s853_s0 = inlined_call_operand.vmem [shape: f32[2,4,256], index: 0, kind: input, shape index: {}]   ;;  %s854_s1 = inlined_call_operand.vmem [shape: f32[256,64], index: 1, kind: input, shape index: {}]   ;;  %s855_s2 = inlined_call_operand.hbm [shape: f32[2,4,64], index: 2, kind: output, shape index: {}]  }
   0x1   :  { %9 = vsyncpa [#allocation3 + $0x1], 0  ;;  %s645_s9 = smov 0   ;;  %s647_s10 = smov 0  }
   0x2   :  { %s649_s11 = smov 0   ;;  %s651_s12 = smov 0  }
   0x3   :  { %s653_s13 = smov 0   ;;  %s655_s14 = smov 0  }
   0x4 LB: > { %s410_s15 = sadd.s32 4294967295, %s626_s14   ;;  %s411_s16 = sadd.s32 4294967294, %s626_s14   ;;  %s626_s14 = sphi %s655_s14, %s15_s14   ;;  %s622_s13 = sphi %s653_s13, %s862_s13   ;;  %s618_s12 = sphi %s651_s12, %s861_s12   ;;  %s614_s11 = sphi %s649_s11, %s860_s11   ;;  %s610_s10 = sphi %s647_s10, %s859_s10   ;;  %s606_s9 = sphi %s645_s9, %s858_s9  }
   0x5   : > { %s27_s17 = sadd.s32 1, %s622_s13  ;;  %s88_s18 = sadd.s32 1, %s614_s11 }
   0x6   : > { %p29_p0 = scmp.ge.s32.totalorder %s27_s17, 2  ;;  %p98_p1 = scmp.ne.s32.totalorder %s614_s11, %s610_s10 }
   0x7   : > { %p99_p2 = scmp.eq.s32.totalorder %s410_s15, 1  ;;  %p104_p3 = scmp.ne.s32.totalorder %s610_s10, %s606_s9 }
   0x8   : > { %s864_s17 = smov (%p29_p0, %s27_s17), 0  ;;  %p105_p5 = scmp.eq.s32.totalorder %s411_s16, 1 }
   0x9   : > { %p685_p4 = por %p99_p2, %p98_p1  ;;  %s85_s20 = ssub.s32 %s622_s13, %s864_s17 }
   0xa   : > { %p415_p6 = scmp.ge.s32.totalorder %s626_s14, 1  ;;  %p86_p7 = scmp.eq.s32.totalorder %s85_s20, 0 }
   0xb   : > { %p692_p8 = por %p105_p5, %p104_p3  ;;  %p145_p9 = scmp.lt.s32.totalorder %s626_s14, 3 }
   0xc   : > { %s698_s22 = scalar_select %p86_p7, %s614_s11, %s88_s18  }
   0xd   : > { %p146_p10 = pnand %p415_p6, %p145_p9 }
   0xe   : > { %v216_v0 = vld [vmem:[%s854_s1 + $0x80] sm:$0xff] (!%p146_p10)  ;;  %v217_v1 = vld [vmem:[%s854_s1 + $0x88] sm:$0xff] (!%p146_p10)  ;;  %p177_p11 = scmp.lt.s32.totalorder (!%p146_p10), %s618_s12, 1  ;;  %v218_v5 = vld [vmem:[%s854_s1 + $0x90] sm:$0xff] (!%p146_p10)  ;;  %s173_s16 = sand.u32 (!%p146_p10), 1, %s610_s10   ;;  %vm196_vm0 = vcmask (!%p146_p10), 519168  }
   0xf   : > { %149 = sbr.rel (%p146_p10) target bundleno = 280 (0x118), region = 28  ;;  %v200_v2 = vld [vmem:[%s854_s1] sm:$0xff] (!%p146_p10)  ;;  %v459_v3 = vpack.c.bf16 (!%p146_p10), %v217_v1, %v216_v0  ;;  %v201_v4 = vld [vmem:[%s854_s1 + $0x8] sm:$0xff] (!%p146_p10)  ;;  %v219_v6 = vld [vmem:[%s854_s1 + $0x98] sm:$0xff] (!%p146_p10)  ;;  %s416_s18 = sshll.u32 (!%p146_p10), %s173_s16, 2  ;;  %v628_v50 = vmov (!%p146_p10), 0.0  }
  0x10   : > { %v461_v7 = vpack.c.bf16 (!%p146_p10), %v201_v4, %v200_v2  ;;  %v463_v8 = vpack.c.bf16 (!%p146_p10), %v219_v6, %v218_v5  ;;  %v202_v9 = vld [vmem:[%s854_s1 + $0x10] sm:$0xff] (!%p146_p10)  ;;  %v203_v10 = vld [vmem:[%s854_s1 + $0x18] sm:$0xff] (!%p146_p10)  ;;  %v220_v11 = vld [vmem:[%s854_s1 + $0xa0] sm:$0xff] (!%p146_p10)  ;;  %s175_s20 = scalar_lea.vmem (!%p146_p10), [#allocation2], %s416_s18 }
  0x11   : > { %460 = vmatprep.subr.bf16.mxu0 (!%p146_p10), %v459_v3  ;;  %v221_v12 = vld [vmem:[%s854_s1 + $0xa8] sm:$0xff] (!%p146_p10)  ;;  %v465_v13 = vpack.c.bf16 (!%p146_p10), %v203_v10, %v202_v9  ;;  %v204_v15 = vld [vmem:[%s854_s1 + $0x20] sm:$0xff] (!%p146_p10)  ;;  %v222_v17 = vld [vmem:[%s854_s1 + $0xb0] sm:$0xff] (!%p146_p10)  ;;  %197 = vst.msk [vmem:[%s175_s20] sm:$0xf] (!%p146_p10), %vm196_vm0, %v628_v50  ;;  %s322_s24 = sshll.u32 (!%p146_p10), %s175_s20, 4  ;;  %s808_s24 = int_to_ptr.vmem [resolvable:$true] %s322_s24 }
  0x12   : > { %462 = vmatpush3.bf16.msra.mxu0 (!%p146_p10), %v461_v7  ;;  %v467_v14 = vpack.c.bf16 (!%p146_p10), %v221_v12, %v220_v11  ;;  %v205_v16 = vld [vmem:[%s854_s1 + $0x28] sm:$0xff] (!%p146_p10)  ;;  %v223_v18 = vld [vmem:[%s854_s1 + $0xb8] sm:$0xff] (!%p146_p10)  ;;  %v206_v21 = vld [vmem:[%s854_s1 + $0x30] sm:$0xff] (!%p146_p10)  ;;  %s548_s29 = scalar_lea.vmem (!%p146_p10), %s808_s24, 64 }
  0x13   : > { %464 = vmatprep.subr.bf16.mxu0 (!%p146_p10), %v463_v8  ;;  %v469_v19 = vpack.c.bf16 (!%p146_p10), %v205_v16, %v204_v15  ;;  %v471_v20 = vpack.c.bf16 (!%p146_p10), %v223_v18, %v222_v17  ;;  %v207_v22 = vld [vmem:[%s854_s1 + $0x38] sm:$0xff] (!%p146_p10)  ;;  %v224_v23 = vld [vmem:[%s854_s1 + $0xc0] sm:$0xff] (!%p146_p10)  ;;  %v225_v24 = vld [vmem:[%s854_s1 + $0xc8] sm:$0xff] (!%p146_p10)  ;;  %p549_p12 = scmp.ne.s32.totalorder (!%p146_p10), %s808_s24, %s548_s29 }
  0x14   : > { %v473_v27 = vpack.c.bf16 (!%p146_p10), %v207_v22, %v206_v21  ;;  %v475_v28 = vpack.c.bf16 (!%p146_p10), %v225_v24, %v224_v23  ;;  %v208_v29 = vld [vmem:[%s854_s1 + $0x40] sm:$0xff] (!%p146_p10)  ;;  %v209_v30 = vld [vmem:[%s854_s1 + $0x48] sm:$0xff] (!%p146_p10)  ;;  %v226_v31 = vld [vmem:[%s854_s1 + $0xd0] sm:$0xff] (!%p146_p10) }
  0x15   : > { %v227_v32 = vld [vmem:[%s854_s1 + $0xd8] sm:$0xff] (!%p146_p10)  ;;  %v477_v33 = vpack.c.bf16 (!%p146_p10), %v209_v30, %v208_v29  ;;  %v210_v35 = vld [vmem:[%s854_s1 + $0x50] sm:$0xff] (!%p146_p10)  ;;  %v228_v37 = vld [vmem:[%s854_s1 + $0xe0] sm:$0xff] (!%p146_p10)  ;;  %p550_p13 = pnand (!%p146_p10), %p549_p12, %p685_p4 }
  0x16   : > { %s178_s23 = scalar_select %p177_p11, %s618_s12, 1  ;;  %466 = vmatpush3.bf16.msra.mxu0 %v465_v13  ;;  %v479_v34 = vpack.c.bf16 %v227_v32, %v226_v31  ;;  %v211_v36 = vld [vmem:[%s854_s1 + $0x58] sm:$0xff]  ;;  %v229_v38 = vld [vmem:[%s854_s1 + $0xe8] sm:$0xff]  ;;  %v212_v41 = vld [vmem:[%s854_s1 + $0x60] sm:$0xff] }
  0x17   : > { %468 = vmatprep.subr.bf16.mxu0 %v467_v14  ;;  %v481_v39 = vpack.c.bf16 %v211_v36, %v210_v35  ;;  %v483_v40 = vpack.c.bf16 %v229_v38, %v228_v37  ;;  %v213_v42 = vld [vmem:[%s854_s1 + $0x68] sm:$0xff]  ;;  %v230_v43 = vld [vmem:[%s854_s1 + $0xf0] sm:$0xff]  ;;  %v231_v44 = vld [vmem:[%s854_s1 + $0xf8] sm:$0xff]  ;;  %p551_p0 = pneg %p550_p13 }
  0x18   : > { %s423_s26 = sshll.u32 %s178_s23, 3  ;;  %v485_v45 = vpack.c.bf16 %v213_v42, %v212_v41  ;;  %v487_v46 = vpack.c.bf16 %v231_v44, %v230_v43  ;;  %v214_v47 = vld [vmem:[%s854_s1 + $0x70] sm:$0xff]  ;;  %v215_v48 = vld [vmem:[%s854_s1 + $0x78] sm:$0xff]  ;;  %v198_v52 = vld [vmem:[%s175_s20] sm:$0xf]  ;;  %s420_s23 = sshll.u32 %s618_s12, 6 }
  0x19   : > { %s184_s15 = scalar_lea.vmem %s853_s0, %s423_s26  ;;  %v489_v49 = vpack.c.bf16 %v215_v48, %v214_v47  ;;  %s806_s28 = scalar_lea.hbm %s855_s2, %s420_s23 }
  0x1a   : > { %v199_v25 = vld [vmem:[%s184_s15] sm:$0xff]  ;;  %470 = vmatpush3.bf16.msra.mxu0 %v469_v19  ;;  %s309_s26 = scalar_lea.sflag [#allocation3], %s173_s16  ;;  %s629_s12 = smov [#allocation2]  }
  0x1b   : > { %v233_v26 = vcombine.high %v199_v25, %v199_v25  ;;  %472 = vmatprep.subr.bf16.mxu0 %v471_v20  ;;  %s552_s30 = sshll.u32 %s629_s12, 4  ;;  %s553_s30 = int_to_ptr.vmem [resolvable:$false] %s552_s30 }
  0x1c   : > { %s554_s3 = scalar_lea.vmem %s553_s30, 128  ;;  %p555_p1 = scmp.lt.s32.totalorder %s808_s24, %s553_s30 }
  0x1d   : > { %299 = vmatprep.mubr.f32.mxu0 %v233_v26  ;;  %p556_p2 = scmp.lt.s32.totalorder %s554_s3, %s548_s29 }
  0x1e   : > { %474 = vmatpush3.bf16.msra.mxu0 %v473_v27 }
  0x1f   : > { %476 = vmatprep.subr.bf16.mxu0 %v475_v28  ;;  %p557_p3 = por %p556_p2, %p555_p1 }
  0x21   : > { %p558_p5 = pnand %p557_p3, %p551_p0 }
  0x22   : > { %478 = vmatpush3.bf16.msra.mxu0 %v477_v33 }
  0x23   : > { %480 = vmatprep.subr.bf16.mxu0 %v479_v34 }
  0x26   : > { %482 = vmatpush3.bf16.msra.mxu0 %v481_v39 }
  0x27   : > { %484 = vmatprep.subr.bf16.mxu0 %v483_v40 }
  0x2a   : > { %486 = vmatpush3.bf16.msra.mxu0 %v485_v45 }
  0x2b   : > { %488 = vmatprep.subr.bf16.mxu0 %v487_v46 }
  0x2e   : > { %490 = vmatpush3.bf16.msra.mxu0 %v489_v49 }
  0x31   : > { %300 = vmatmul.mubr.f32.vlgmr.msra.gmra.mrb[0].mxu0 %v199_v25 }
 0x104   : > { %v456_v51 = vpop.f32.mrb[0].mxu0 }
 0x105   : > { %v457_v53 = vpop.f32.mrb[1].mxu0 }
 0x106   : > { %v458_v54 = vadd.f32 %v457_v53, %v456_v51 }
 0x108   : > { %v305_v55 = vadd.f32 %v458_v54, %v198_v52 }
 0x10a   : > { %307 = vst.msk [vmem:[%s175_s20] sm:$0xf] %vm196_vm0, %v305_v55 }
 0x10b   : > { %561 = shalt.err (!%p558_p5)
}
 0x10c   : > { %s562_s4 = scalar_lea.hbm %s806_s28, 64  ;;  %s566_s7 = scalar_lea.hbm %s855_s2, 128 }
 0x10d   : > { %p563_p6 = scmp.ne.s32.totalorder %s806_s28, %s562_s4  ;;  %p567_p10 = scmp.lt.u32.totalorder %s806_s28, %s855_s2 }
 0x10e   : > { %p568_p11 = scmp.lt.u32.totalorder %s566_s7, %s562_s4  ;;  %p570_p13 = scmp.lt.u32.totalorder %s562_s4, %s806_s28 }
 0x10f   : > { %p564_p7 = pnand %p563_p6, %p685_p4 }
 0x110   : > { %p569_p12 = por %p568_p11, %p567_p10 }
 0x111   : > { %p565_p9 = pneg %p564_p7 }
 0x112   : > { %p571_p0 = por %p570_p13, %p569_p12 }
 0x114   : > { %p572_p1 = pnand %p571_p0, %p565_p9 }
 0x116   : > { %575 = shalt.err (!%p572_p1)
}
 0x117   : > { %491 = dma.vmem_to_hbm [thread:$0]  (%p685_p4), %s808_s24, 64, %s806_s28, %s309_s26  }
 0x118 PF: > { %p497_p2 = scmp.ge.s32.totalorder %s626_s14, 2  ;;  %s334_s16 = sand.u32 1, %s606_s9  }
 0x119   : > { %s335_s18 = scalar_lea.sflag [#allocation3], %s334_s16 }
 0x11a   : > { %p494_p3 = pnand %p497_p2, %p692_p8 }
 0x11c   : > { %601 = dma.done.wait (!%p494_p3), %s335_s18, 64  }
 0x11d   : > { %603 = vsyncadd (!%p494_p3), %s335_s18, 4294967232  ;;  %s15_s14 = sadd.s32 1, %s626_s14   ;;  %s858_s9 = smov %s610_s10 }
 0x11e   : > { %p12_p5 = scmp.ge.s32.totalorder %s15_s14, 4   ;;  %s859_s10 = smov %s614_s11 }
 0x11f   : > { %s860_s11 = smov %s698_s22  ;;  %s861_s12 = smov %s622_s13 }
 0x120   : > { %s862_s13 = smov %s864_s17  ;;  %14 = sbr.rel (!%p12_p5) target bundleno = 4 (0x4), region = 70 }
 0x127   :  { %340 = vsyncpa [#allocation3], 1 }
 0x128   :  { %342 = vsyncpa [#allocation3 + $0x1], 1 }

// kernel: tpu_custom_call.1
= control target key start
LH: loop header
LB: loop body
LE: loop exit
PB: predicated region body
PF: predicated region fallthrough
CT: control target
= control target key end

     0   :  { %7 = vsyncpa [#allocation3], 0  ;;  %s853_s0 = inlined_call_operand.vmem [shape: f32[2,4,256], index: 0, kind: input, shape index: {}]   ;;  %s854_s1 = inlined_call_operand.vmem [shape: f32[256,64], index: 1, kind: input, shape index: {}]   ;;  %s855_s2 = inlined_call_operand.hbm [shape: f32[2,4,64], index: 2, kind: output, shape index: {}]  }
   0x1   :  { %9 = vsyncpa [#allocation3 + $0x1], 0  ;;  %s645_s9 = smov 0   ;;  %s647_s10 = smov 0  }
   0x2   :  { %s649_s11 = smov 0   ;;  %s651_s12 = smov 0  }
   0x3   :  { %s653_s13 = smov 0   ;;  %s655_s14 = smov 0  }
   0x4 LB: > { %s410_s15 = sadd.s32 4294967295, %s626_s14   ;;  %s411_s16 = sadd.s32 4294967294, %s626_s14   ;;  %s626_s14 = sphi %s655_s14, %s15_s14   ;;  %s622_s13 = sphi %s653_s13, %s862_s13   ;;  %s618_s12 = sphi %s651_s12, %s861_s12   ;;  %s614_s11 = sphi %s649_s11, %s860_s11   ;;  %s610_s10 = sphi %s647_s10, %s859_s10   ;;  %s606_s9 = sphi %s645_s9, %s858_s9  }
   0x5   : > { %s27_s17 = sadd.s32 1, %s622_s13  ;;  %s88_s18 = sadd.s32 1, %s614_s11 }
   0x6   : > { %p29_p0 = scmp.ge.s32.totalorder %s27_s17, 2  ;;  %p98_p1 = scmp.ne.s32.totalorder %s614_s11, %s610_s10 }
   0x7   : > { %p99_p2 = scmp.eq.s32.totalorder %s410_s15, 1  ;;  %p104_p3 = scmp.ne.s32.totalorder %s610_s10, %s606_s9 }
   0x8   : > { %s864_s17 = smov (%p29_p0, %s27_s17), 0  ;;  %p105_p5 = scmp.eq.s32.totalorder %s411_s16, 1 }
   0x9   : > { %p685_p4 = por %p99_p2, %p98_p1  ;;  %s85_s20 = ssub.s32 %s622_s13, %s864_s17 }
   0xa   : > { %p415_p6 = scmp.ge.s32.totalorder %s626_s14, 1  ;;  %p86_p7 = scmp.eq.s32.totalorder %s85_s20, 0 }
   0xb   : > { %p692_p8 = por %p105_p5, %p104_p3  ;;  %p145_p9 = scmp.lt.s32.totalorder %s626_s14, 3 }
   0xc   : > { %s698_s22 = scalar_select %p86_p7, %s614_s11, %s88_s18  }
   0xd   : > { %p146_p10 = pnand %p415_p6, %p145_p9 }
   0xe   : > { %v216_v0 = vld [vmem:[%s854_s1 + $0x80] sm:$0xff] (!%p146_p10)  ;;  %v217_v1 = vld [vmem:[%s854_s1 + $0x88] sm:$0xff] (!%p146_p10)  ;;  %p177_p11 = scmp.lt.s32.totalorder (!%p146_p10), %s618_s12, 1  ;;  %v218_v5 = vld [vmem:[%s854_s1 + $0x90] sm:$0xff] (!%p146_p10)  ;;  %s173_s16 = sand.u32 (!%p146_p10), 1, %s610_s10   ;;  %vm196_vm0 = vcmask (!%p146_p10), 519168  }
   0xf   : > { %149 = sbr.rel (%p146_p10) target bundleno = 280 (0x118), region = 28  ;;  %v200_v2 = vld [vmem:[%s854_s1] sm:$0xff] (!%p146_p10)  ;;  %v459_v3 = vpack.c.bf16 (!%p146_p10), %v217_v1, %v216_v0  ;;  %v201_v4 = vld [vmem:[%s854_s1 + $0x8] sm:$0xff] (!%p146_p10)  ;;  %v219_v6 = vld [vmem:[%s854_s1 + $0x98] sm:$0xff] (!%p146_p10)  ;;  %s416_s18 = sshll.u32 (!%p146_p10), %s173_s16, 2  ;;  %v628_v50 = vmov (!%p146_p10), 0.0  }
  0x10   : > { %v461_v7 = vpack.c.bf16 (!%p146_p10), %v201_v4, %v200_v2  ;;  %v463_v8 = vpack.c.bf16 (!%p146_p10), %v219_v6, %v218_v5  ;;  %v202_v9 = vld [vmem:[%s854_s1 + $0x10] sm:$0xff] (!%p146_p10)  ;;  %v203_v10 = vld [vmem:[%s854_s1 + $0x18] sm:$0xff] (!%p146_p10)  ;;  %v220_v11 = vld [vmem:[%s854_s1 + $0xa0] sm:$0xff] (!%p146_p10)  ;;  %s175_s20 = scalar_lea.vmem (!%p146_p10), [#allocation2], %s416_s18 }
  0x11   : > { %460 = vmatprep.subr.bf16.mxu0 (!%p146_p10), %v459_v3  ;;  %v221_v12 = vld [vmem:[%s854_s1 + $0xa8] sm:$0xff] (!%p146_p10)  ;;  %v465_v13 = vpack.c.bf16 (!%p146_p10), %v203_v10, %v202_v9  ;;  %v204_v15 = vld [vmem:[%s854_s1 + $0x20] sm:$0xff] (!%p146_p10)  ;;  %v222_v17 = vld [vmem:[%s854_s1 + $0xb0] sm:$0xff] (!%p146_p10)  ;;  %197 = vst.msk [vmem:[%s175_s20] sm:$0xf] (!%p146_p10), %vm196_vm0, %v628_v50  ;;  %s322_s24 = sshll.u32 (!%p146_p10), %s175_s20, 4  ;;  %s808_s24 = int_to_ptr.vmem [resolvable:$true] %s322_s24 }
  0x12   : > { %462 = vmatpush3.bf16.msra.mxu0 (!%p146_p10), %v461_v7  ;;  %v467_v14 = vpack.c.bf16 (!%p146_p10), %v221_v12, %v220_v11  ;;  %v205_v16 = vld [vmem:[%s854_s1 + $0x28] sm:$0xff] (!%p146_p10)  ;;  %v223_v18 = vld [vmem:[%s854_s1 + $0xb8] sm:$0xff] (!%p146_p10)  ;;  %v206_v21 = vld [vmem:[%s854_s1 + $0x30] sm:$0xff] (!%p146_p10)  ;;  %s548_s29 = scalar_lea.vmem (!%p146_p10), %s808_s24, 64 }
  0x13   : > { %464 = vmatprep.subr.bf16.mxu0 (!%p146_p10), %v463_v8  ;;  %v469_v19 = vpack.c.bf16 (!%p146_p10), %v205_v16, %v204_v15  ;;  %v471_v20 = vpack.c.bf16 (!%p146_p10), %v223_v18, %v222_v17  ;;  %v207_v22 = vld [vmem:[%s854_s1 + $0x38] sm:$0xff] (!%p146_p10)  ;;  %v224_v23 = vld [vmem:[%s854_s1 + $0xc0] sm:$0xff] (!%p146_p10)  ;;  %v225_v24 = vld [vmem:[%s854_s1 + $0xc8] sm:$0xff] (!%p146_p10)  ;;  %p549_p12 = scmp.ne.s32.totalorder (!%p146_p10), %s808_s24, %s548_s29 }
  0x14   : > { %v473_v27 = vpack.c.bf16 (!%p146_p10), %v207_v22, %v206_v21  ;;  %v475_v28 = vpack.c.bf16 (!%p146_p10), %v225_v24, %v224_v23  ;;  %v208_v29 = vld [vmem:[%s854_s1 + $0x40] sm:$0xff] (!%p146_p10)  ;;  %v209_v30 = vld [vmem:[%s854_s1 + $0x48] sm:$0xff] (!%p146_p10)  ;;  %v226_v31 = vld [vmem:[%s854_s1 + $0xd0] sm:$0xff] (!%p146_p10) }
  0x15   : > { %v227_v32 = vld [vmem:[%s854_s1 + $0xd8] sm:$0xff] (!%p146_p10)  ;;  %v477_v33 = vpack.c.bf16 (!%p146_p10), %v209_v30, %v208_v29  ;;  %v210_v35 = vld [vmem:[%s854_s1 + $0x50] sm:$0xff] (!%p146_p10)  ;;  %v228_v37 = vld [vmem:[%s854_s1 + $0xe0] sm:$0xff] (!%p146_p10)  ;;  %p550_p13 = pnand (!%p146_p10), %p549_p12, %p685_p4 }
  0x16   : > { %s178_s23 = scalar_select %p177_p11, %s618_s12, 1  ;;  %466 = vmatpush3.bf16.msra.mxu0 %v465_v13  ;;  %v479_v34 = vpack.c.bf16 %v227_v32, %v226_v31  ;;  %v211_v36 = vld [vmem:[%s854_s1 + $0x58] sm:$0xff]  ;;  %v229_v38 = vld [vmem:[%s854_s1 + $0xe8] sm:$0xff]  ;;  %v212_v41 = vld [vmem:[%s854_s1 + $0x60] sm:$0xff] }
  0x17   : > { %468 = vmatprep.subr.bf16.mxu0 %v467_v14  ;;  %v481_v39 = vpack.c.bf16 %v211_v36, %v210_v35  ;;  %v483_v40 = vpack.c.bf16 %v229_v38, %v228_v37  ;;  %v213_v42 = vld [vmem:[%s854_s1 + $0x68] sm:$0xff]  ;;  %v230_v43 = vld [vmem:[%s854_s1 + $0xf0] sm:$0xff]  ;;  %v231_v44 = vld [vmem:[%s854_s1 + $0xf8] sm:$0xff]  ;;  %p551_p0 = pneg %p550_p13 }
  0x18   : > { %s423_s26 = sshll.u32 %s178_s23, 3  ;;  %v485_v45 = vpack.c.bf16 %v213_v42, %v212_v41  ;;  %v487_v46 = vpack.c.bf16 %v231_v44, %v230_v43  ;;  %v214_v47 = vld [vmem:[%s854_s1 + $0x70] sm:$0xff]  ;;  %v215_v48 = vld [vmem:[%s854_s1 + $0x78] sm:$0xff]  ;;  %v198_v52 = vld [vmem:[%s175_s20] sm:$0xf]  ;;  %s420_s23 = sshll.u32 %s618_s12, 6 }
  0x19   : > { %s184_s15 = scalar_lea.vmem %s853_s0, %s423_s26  ;;  %v489_v49 = vpack.c.bf16 %v215_v48, %v214_v47  ;;  %s806_s28 = scalar_lea.hbm %s855_s2, %s420_s23 }
  0x1a   : > { %v199_v25 = vld [vmem:[%s184_s15] sm:$0xff]  ;;  %470 = vmatpush3.bf16.msra.mxu0 %v469_v19  ;;  %s309_s26 = scalar_lea.sflag [#allocation3], %s173_s16  ;;  %s629_s12 = smov [#allocation2]  }
  0x1b   : > { %v233_v26 = vcombine.high %v199_v25, %v199_v25  ;;  %472 = vmatprep.subr.bf16.mxu0 %v471_v20  ;;  %s552_s30 = sshll.u32 %s629_s12, 4  ;;  %s553_s30 = int_to_ptr.vmem [resolvable:$false] %s552_s30 }
  0x1c   : > { %s554_s3 = scalar_lea.vmem %s553_s30, 128  ;;  %p555_p1 = scmp.lt.s32.totalorder %s808_s24, %s553_s30 }
  0x1d   : > { %299 = vmatprep.mubr.f32.mxu0 %v233_v26  ;;  %p556_p2 = scmp.lt.s32.totalorder %s554_s3, %s548_s29 }
  0x1e   : > { %474 = vmatpush3.bf16.msra.mxu0 %v473_v27 }
  0x1f   : > { %476 = vmatprep.subr.bf16.mxu0 %v475_v28  ;;  %p557_p3 = por %p556_p2, %p555_p1 }
  0x21   : > { %p558_p5 = pnand %p557_p3, %p551_p0 }
  0x22   : > { %478 = vmatpush3.bf16.msra.mxu0 %v477_v33 }
  0x23   : > { %480 = vmatprep.subr.bf16.mxu0 %v479_v34 }
  0x26   : > { %482 = vmatpush3.bf16.msra.mxu0 %v481_v39 }
  0x27   : > { %484 = vmatprep.subr.bf16.mxu0 %v483_v40 }
  0x2a   : > { %486 = vmatpush3.bf16.msra.mxu0 %v485_v45 }
  0x2b   : > { %488 = vmatprep.subr.bf16.mxu0 %v487_v46 }
  0x2e   : > { %490 = vmatpush3.bf16.msra.mxu0 %v489_v49 }
  0x31   : > { %300 = vmatmul.mubr.f32.vlgmr.msra.gmra.mrb[0].mxu0 %v199_v25 }
 0x104   : > { %v456_v51 = vpop.f32.mrb[0].mxu0 }
 0x105   : > { %v457_v53 = vpop.f32.mrb[1].mxu0 }
 0x106   : > { %v458_v54 = vadd.f32 %v457_v53, %v456_v51 }
 0x108   : > { %v305_v55 = vadd.f32 %v458_v54, %v198_v52 }
 0x10a   : > { %307 = vst.msk [vmem:[%s175_s20] sm:$0xf] %vm196_vm0, %v305_v55 }
 0x10b   : > { %561 = shalt.err (!%p558_p5)
}
 0x10c   : > { %s562_s4 = scalar_lea.hbm %s806_s28, 64  ;;  %s566_s7 = scalar_lea.hbm %s855_s2, 128 }
 0x10d   : > { %p563_p6 = scmp.ne.s32.totalorder %s806_s28, %s562_s4  ;;  %p567_p10 = scmp.lt.u32.totalorder %s806_s28, %s855_s2 }
 0x10e   : > { %p568_p11 = scmp.lt.u32.totalorder %s566_s7, %s562_s4  ;;  %p570_p13 = scmp.lt.u32.totalorder %s562_s4, %s806_s28 }
 0x10f   : > { %p564_p7 = pnand %p563_p6, %p685_p4 }
 0x110   : > { %p569_p12 = por %p568_p11, %p567_p10 }
 0x111   : > { %p565_p9 = pneg %p564_p7 }
 0x112   : > { %p571_p0 = por %p570_p13, %p569_p12 }
 0x114   : > { %p572_p1 = pnand %p571_p0, %p565_p9 }
 0x116   : > { %575 = shalt.err (!%p572_p1)
}
 0x117   : > { %491 = dma.vmem_to_hbm [thread:$0]  (%p685_p4), %s808_s24, 64, %s806_s28, %s309_s26  }
 0x118 PF: > { %p497_p2 = scmp.ge.s32.totalorder %s626_s14, 2  ;;  %s334_s16 = sand.u32 1, %s606_s9  }
 0x119   : > { %s335_s18 = scalar_lea.sflag [#allocation3], %s334_s16 }
 0x11a   : > { %p494_p3 = pnand %p497_p2, %p692_p8 }
 0x11c   : > { %601 = dma.done.wait (!%p494_p3), %s335_s18, 64  }
 0x11d   : > { %603 = vsyncadd (!%p494_p3), %s335_s18, 4294967232  ;;  %s15_s14 = sadd.s32 1, %s626_s14   ;;  %s858_s9 = smov %s610_s10 }
 0x11e   : > { %p12_p5 = scmp.ge.s32.totalorder %s15_s14, 4   ;;  %s859_s10 = smov %s614_s11 }
 0x11f   : > { %s860_s11 = smov %s698_s22  ;;  %s861_s12 = smov %s622_s13 }
 0x120   : > { %s862_s13 = smov %s864_s17  ;;  %14 = sbr.rel (!%p12_p5) target bundleno = 4 (0x4), region = 70 }
 0x127   :  { %340 = vsyncpa [#allocation3], 1 }
 0x128   :  { %342 = vsyncpa [#allocation3 + $0x1], 1 }

</bundles_post_ra>
